<compile_context>
chip_gen: v7x
topology: tpu7x:2x2x1
jax: 0.10.0
libtpu: 0.0.40
codegen_flags: <defaults>
</compile_context>

<pallas_src>
import jax
import jax.numpy as jnp
from jax.experimental import pallas as pl
from jax.experimental.pallas import tpu as pltpu

LANES = 1024                           # lane-dense last dim (multiple of 128)
BLOCK_BYTES = 8 * 1024 * 1024          # per-block DMA target, in native dtype
VMEM_LIMIT_BYTES = 44 * 1024 * 1024    # 2x(in+out) 8 MiB blocks = 32 MiB + headroom


def _adaptive_tanh_kernel(p_ref, x_ref, o_ref):
    # p_ref: (3,) float32 scalars in SMEM -> [alpha, scale, translate]
    alpha = p_ref[0]
    scale = p_ref[1]
    translate = p_ref[2]

    x = x_ref[...].astype(jnp.float32)
    z = alpha * (x + translate)
    o_ref[...] = (scale * jnp.tanh(z)).astype(o_ref.dtype)


def _run_kernel(x2d, alpha, scale, translate):
    """Run the Pallas kernel on an already lane-aligned (rows, LANES) slab."""
    rows = x2d.shape[0]
    dtype = x2d.dtype
    itemsize = jnp.dtype(dtype).itemsize

    # Sublane multiple for a legal (non-full-extent) block: 8 for 32-bit,
    # 16 for 16-bit, 32 for 8-bit dtypes.
    sub = 8 if itemsize >= 4 else (16 if itemsize == 2 else 32)

    block_rows_cap = max(BLOCK_BYTES // (LANES * itemsize), sub)
    if rows > block_rows_cap:
        block_rows = block_rows_cap
    else:
        # Split into >=2 grid steps so both v7x TensorCores get work.
        half = -(-rows // 2)
        block_rows = -(-half // sub) * sub      # round up to sublane multiple
        if block_rows >= rows:
            block_rows = rows                   # too small to split: full extent
    grid = (pl.cdiv(rows, block_rows),)

    params = jnp.array([alpha, scale, translate], dtype=jnp.float32)

    n_elem = rows * LANES
    cost = pl.CostEstimate(
        flops=4 * n_elem,
        transcendentals=n_elem,
        bytes_accessed=2 * n_elem * itemsize,
    )

    return pl.pallas_call(
        _adaptive_tanh_kernel,
        out_shape=jax.ShapeDtypeStruct((rows, LANES), dtype),
        grid_spec=pltpu.PrefetchScalarGridSpec(
            num_scalar_prefetch=0,
            grid=grid,
            in_specs=[
                pl.BlockSpec(memory_space=pltpu.SMEM),                # params (3,)
                pl.BlockSpec((block_rows, LANES), lambda i: (i, 0)),  # x tile
            ],
            out_specs=pl.BlockSpec((block_rows, LANES), lambda i: (i, 0)),
        ),
        compiler_params=pltpu.CompilerParams(
            dimension_semantics=("parallel",),
            vmem_limit_bytes=VMEM_LIMIT_BYTES,
        ),
        cost_estimate=cost,
    )(params, x2d)


def adaptive_tanh(x, alpha=1.0, scale=1.0, translate=0.0):
    """Elementwise adaptive tanh: scale * tanh(alpha * (x + translate))."""
    orig_shape = x.shape
    orig_dtype = x.dtype

    flat = x.reshape(-1)
    n = flat.shape[0]
    rows = n // LANES
    rem = n - rows * LANES

    pieces = []
    if rows > 0:
        if rem == 0:
            main = flat.reshape(rows, LANES)          # zero-copy reshape
        else:
            main = flat[: rows * LANES].reshape(rows, LANES)
        out2d = _run_kernel(main, alpha, scale, translate)
        pieces.append(out2d.reshape(-1))
    if rem > 0:
        # Tiny ragged tail (< LANES elements): plain jnp, same f32 math.
        tail = flat[rows * LANES:].astype(jnp.float32)
        a = jnp.float32(alpha)
        s = jnp.float32(scale)
        t = jnp.float32(translate)
        pieces.append((s * jnp.tanh(a * (tail + t))).astype(orig_dtype))

    out_flat = pieces[0] if len(pieces) == 1 else jnp.concatenate(pieces)
    return out_flat.reshape(orig_shape)


if __name__ == "__main__":
    key = jax.random.PRNGKey(0)
    # Input shape consistent with "(N, *)": small NCHW tensor.
    x = jax.random.normal(key, (2, 4, 16, 16), dtype=jnp.float32)

    # Deterministic (non-trivial) parameters.
    alpha, scale, translate = 1.25, 0.8, 0.1

    y = adaptive_tanh(x, alpha=alpha, scale=scale, translate=translate)
    y = jax.block_until_ready(y)

    # Reference check against the module's explicit exp formula.
    xt = x + translate
    ref = scale * (jnp.exp(alpha * xt) - jnp.exp(-alpha * xt)) / (
        jnp.exp(alpha * xt) + jnp.exp(-alpha * xt)
    )
    assert y.shape == x.shape and y.dtype == x.dtype
    assert jnp.allclose(y, ref, atol=1e-5, rtol=1e-5)

    # Also exercise a ragged (non-multiple-of-1024) shape to cover the
    # aligned-prefix + tail path.
    x2 = jax.random.normal(jax.random.PRNGKey(1), (3, 5, 7, 11), dtype=jnp.float32)
    y2 = jax.block_until_ready(adaptive_tanh(x2, alpha, scale, translate))
    ref2 = scale * jnp.tanh(alpha * (x2 + translate))
    assert y2.shape == x2.shape and jnp.allclose(y2, ref2, atol=1e-5, rtol=1e-5)

    print("KERNEL_OK")
</pallas_src>

<mosaic_0001>
module attributes {stable_mosaic.version = 11 : i64} {
  func.func @_adaptive_tanh_kernel(%arg0: i32, %arg1: memref<3xf32, #tpu.memory_space<smem>>, %arg2: memref<2x1024xf32, #tpu.memory_space<vmem>>, %arg3: memref<2x1024xf32, #tpu.memory_space<vmem>>) attributes {dimension_semantics = [#tpu.dimension_semantics<parallel>], iteration_bounds = array<i64: 1>, scalar_prefetch = 0 : i64, scratch_operands = 0 : i64, tpu.core_type = #tpu.core_type<tc>, window_params = [{transform_indices = @transform_0, window_bounds = array<i64: 3>}, {transform_indices = @transform_1, window_bounds = array<i64: 2, 1024>}, {transform_indices = @transform_2, window_bounds = array<i64: 2, 1024>}]} {
    %c0 = arith.constant 0 : index
    %0 = memref.load %arg1[%c0] : memref<3xf32, #tpu.memory_space<smem>>
    %c1 = arith.constant 1 : index
    %1 = memref.load %arg1[%c1] : memref<3xf32, #tpu.memory_space<smem>>
    %c2 = arith.constant 2 : index
    %2 = memref.load %arg1[%c2] : memref<3xf32, #tpu.memory_space<smem>>
    %c0_0 = arith.constant 0 : index
    %c0_1 = arith.constant 0 : index
    %3 = vector.load %arg2[%c0_0, %c0_1] : memref<2x1024xf32, #tpu.memory_space<vmem>>, vector<2x1024xf32>
    %4 = vector.broadcast %2 : f32 to vector<2x1024xf32>
    %5 = arith.addf %3, %4 : vector<2x1024xf32>
    %6 = vector.broadcast %0 : f32 to vector<2x1024xf32>
    %7 = arith.mulf %6, %5 : vector<2x1024xf32>
    %8 = math.tanh %7 : vector<2x1024xf32>
    %9 = vector.broadcast %1 : f32 to vector<2x1024xf32>
    %10 = arith.mulf %9, %8 : vector<2x1024xf32>
    %c0_2 = arith.constant 0 : index
    %c0_3 = arith.constant 0 : index
    %11 = vector.load %arg3[%c0_2, %c0_3] : memref<2x1024xf32, #tpu.memory_space<vmem>>, vector<2x1024xf32>
    tpu.vector_store %arg3[%c0_2, %c0_3], %10 {strides = array<i32>} : memref<2x1024xf32, #tpu.memory_space<vmem>>, vector<2x1024xf32>,
    return
  }
  func.func @transform_0(%arg0: i32) -> i32 {
    %c0_i32 = arith.constant 0 : i32
    %c0_i32_0 = arith.constant 0 : i32
    return %c0_i32 : i32
  }
  func.func @transform_1(%arg0: i32) -> (i32, i32) {
    %c0_i32 = arith.constant 0 : i32
    %c0_i32_0 = arith.constant 0 : i32
    return %arg0, %c0_i32 : i32, i32
  }
  func.func @transform_2(%arg0: i32) -> (i32, i32) {
    %c0_i32 = arith.constant 0 : i32
    %c0_i32_0 = arith.constant 0 : i32
    return %arg0, %c0_i32 : i32, i32
  }
}

</mosaic_0001>

<bundles_post_ra>
// kernel: tpu_custom_call.1
= control target key start
LH: loop header
LB: loop body
LE: loop exit
PB: predicated region body
PF: predicated region fallthrough
CT: control target
= control target key end

     0   :  { %7 = vsyncpa [#allocation5], 0  ;;  %s192_s0 = inlined_call_operand.hbm [shape: f32[3], index: 0, kind: input, shape index: {}]   ;;  %s193_s1 = inlined_call_operand.hbm [shape: f32[2,1024], index: 1, kind: input, shape index: {}]   ;;  %s194_s2 = inlined_call_operand.hbm [shape: f32[2,1024], index: 2, kind: output, shape index: {}]  }
   0x1   :  { %8 = vsyncpa [#allocation3], 0 }
   0x2   :  { %9 = vsyncpa [#allocation4], 0  ;;  %s78_s11 = scalar_lea.hbm %s192_s0, 16 }
   0x3   :  { %p79_p0 = scmp.ne.s32.totalorder %s192_s0, %s78_s11  ;;  %p82_p1 = scmp.lt.u32.totalorder %s78_s11, %s192_s0 }
   0x5   :  { %p84_p2 = pnand %p82_p1, %p79_p0 }
   0x7   :  { %87 = shalt.err (!%p84_p2)
}
   0x8   :  { %s138_s16 = smov [#allocation2]   ;;  %s139_s19 = smov [#allocation6]  }
   0x9   :  { %17 = dma.hbm_to_smem %s192_s0, 16, %s138_s16, [#allocation5]  }
   0xa   :  { %s24_s20 = sshll.u32 %s139_s19, 4  ;;  %s88_s23 = scalar_lea.hbm %s193_s1, 256  ;;  %s25_s20 = int_to_ptr.vmem [resolvable:$true] %s24_s20 }
   0xb   :  { %p89_p3 = scmp.ne.s32.totalorder %s193_s1, %s88_s23  ;;  %p92_p4 = scmp.lt.u32.totalorder %s88_s23, %s193_s1 }
   0xd   :  { %p94_p5 = pnand %p92_p4, %p89_p3 }
   0xf   :  { %97 = shalt.err (!%p94_p5)
}
  0x10   :  { %s98_s28 = scalar_lea.vmem %s25_s20, 256  ;;  %p103_p7 = scmp.lt.s32.totalorder %s25_s20, %s25_s20 }
  0x11   :  { %p99_p6 = scmp.ne.s32.totalorder %s25_s20, %s98_s28  ;;  %p104_p8 = scmp.lt.s32.totalorder %s98_s28, %s98_s28 }
  0x13   :  { %p105_p9 = por %p104_p8, %p103_p7 }
  0x15   :  { %p106_p10 = pnand %p105_p9, %p99_p6 }
  0x17   :  { %109 = shalt.err (!%p106_p10)
}
  0x18   :  { %27 = dma.hbm_to_vmem [thread:$0]  %s193_s1, 256, %s25_s20, [#allocation3]  }
  0x19   :  { %132 = dma.done.wait [#allocation5], 16  }
  0x1a   :  { %133 = vsyncadd [#allocation5], 4294967280 }
  0x1b   :  { %134 = dma.done.wait [#allocation3], 256  }
  0x1c   :  { %135 = vsyncadd [#allocation3], 4294967040 }
  0x1d   :  { %34 = sfence }
  0x1e   :  { %s35_s30 = sld [smem:[#allocation2]]  ;;  %s70_s3 = sld [smem:[#allocation2 + $0x2]]  ;;  %v38_v0 = vld [vmem:[#allocation6] sm:$0xff]  ;;  %v39_v1 = vld [vmem:[#allocation6 + $0x8] sm:$0xff] }
  0x1f   :  { %s69_s4 = sld [smem:[#allocation2 + $0x1]]  ;;  %s140_s1 = smov [#allocation7]  }
  0x20   :  { %s59_s5 = sshll.u32 %s140_s1, 4  ;;  %s60_s5 = int_to_ptr.vmem [resolvable:$true] %s59_s5 }
  0x21   :  { %s110_s6 = scalar_lea.vmem %s60_s5, 256  ;;  %p115_p12 = scmp.lt.s32.totalorder %s60_s5, %s60_s5 }
  0x22   :  { %p111_p11 = scmp.ne.s32.totalorder %s60_s5, %s110_s6  ;;  %p116_p13 = scmp.lt.s32.totalorder %s110_s6, %s110_s6 }
  0x24   :  { %v40_v2 = vstv %s70_s3  ;;  %v43_v3 = vstv %s35_s30  ;;  %p117_p0 = por %p116_p13, %p115_p12 }
  0x25   :  { %v41_v4 = vadd.f32 %v40_v2, %v38_v0  ;;  %v42_v5 = vadd.f32 %v40_v2, %v39_v1  ;;  %v48_v8 = vstv %s69_s4 }
  0x26   :  { %p118_p1 = pnand %p117_p0, %p111_p11 }
  0x27   :  { %v44_v6 = vmul.f32 %v43_v3, %v41_v4  ;;  %v45_v7 = vmul.f32 %v43_v3, %v42_v5 }
  0x29   :  { %74 = vtanh.f32 %v44_v6 }
  0x2a   :  { %76 = vtanh.f32 %v45_v7 }
  0x33   :  { %v75_v9 = vpop.eup %74 }
  0x34   :  { %v77_v10 = vpop.eup %76  ;;  %v49_v11 = vmul.f32 %v75_v9, %v48_v8 }
  0x35   :  { %v50_v12 = vmul.f32 %v77_v10, %v48_v8 }
  0x36   :  { %51 = vst [vmem:[#allocation7] sm:$0xff] %v49_v11 }
  0x37   :  { %52 = vst [vmem:[#allocation7 + $0x8] sm:$0xff] %v50_v12 }
  0x38   :  { %121 = shalt.err (!%p118_p1)
}
  0x39   :  { %s122_s9 = scalar_lea.hbm %s194_s2, 256 }
  0x3a   :  { %p123_p2 = scmp.ne.s32.totalorder %s194_s2, %s122_s9  ;;  %p126_p3 = scmp.lt.u32.totalorder %s122_s9, %s194_s2 }
  0x3c   :  { %p128_p4 = pnand %p126_p3, %p123_p2 }
  0x3e   :  { %131 = shalt.err (!%p128_p4)
}
  0x3f   :  { %62 = dma.vmem_to_hbm [thread:$0]  %s60_s5, 256, %s194_s2, [#allocation4]  }
  0x40   :  { %136 = dma.done.wait [#allocation4], 256  }
  0x41   :  { %137 = vsyncadd [#allocation4], 4294967040 }
  0x42   :  { %66 = vsyncpa [#allocation3], 1 }
  0x43   :  { %67 = vsyncpa [#allocation4], 1 }
  0x44   :  { %68 = vsyncpa [#allocation5], 1 }

</bundles_post_ra>
